<compile_context>
chip_gen: v6e
topology: v6e:2x2x1
jax: 0.10.0
libtpu: 0.0.40
codegen_flags: <defaults>
</compile_context>

<pallas_src>
import functools
import math

import jax
import jax.numpy as jnp
from jax import lax
from jax.experimental import pallas as pl
from jax.experimental.pallas import tpu as pltpu

_NEG_INF = -1.0e30  # finite "minus infinity" so masked/initial paths never produce NaN


# ---------------------------------------------------------------------------
# helpers
# ---------------------------------------------------------------------------
def _round_up(n, m):
    return ((n + m - 1) // m) * m


def _seq_tile(n, cap):
    """Sequence tile: full (8-aligned) extent when small, else the generation cap."""
    return min(cap, _round_up(n, 8))


def _tpu_caps():
    """(tile cap, vmem_limit_bytes) per TPU generation.

    128-MiB-VMEM parts (v4/v5e/v5p/v6e): 512-wide tiles, 96 MiB limit.
    Anything else (incl. v7x with 64 MiB per TensorCore): 256-wide tiles, 40 MiB.
    """
    cap, vmem_limit = 256, 40 * 1024 * 1024
    try:
        kind = jax.devices()[0].device_kind.lower()
        if any(g in kind for g in ("v4", "v5", "v6")):
            cap, vmem_limit = 512, 96 * 1024 * 1024
    except Exception:
        pass
    return cap, vmem_limit


def _pad_seq(x, target):
    t = x.shape[1]
    if t == target:
        return x
    return jnp.pad(x, ((0, 0), (0, target - t), (0, 0)))


def _weight_spec(shape, index_map, single_buffer):
    """BlockSpec for a grid-invariant operand; single-buffered when supported."""
    if single_buffer:
        return pl.BlockSpec(shape, index_map, pipeline_mode=pl.Buffered(1))
    return pl.BlockSpec(shape, index_map)


def prepare_params(params, compute_dtype=jnp.bfloat16):
    """Cast weights to the MXU compute dtype once (biases stay f32). Idempotent."""
    wq, bq, wk, bk, wv, bv, wo, bo = params
    cw = lambda w: w if w.dtype == compute_dtype else w.astype(compute_dtype)
    cb = lambda b: b if b.dtype == jnp.float32 else b.astype(jnp.float32)
    return (cw(wq), cb(bq), cw(wk), cb(bk), cw(wv), cb(bv), cw(wo), cb(bo))


# ---------------------------------------------------------------------------
# Pass 1: fused linear projection -> head-major layout (B, T, D) -> (B, H, T, dh)
# ---------------------------------------------------------------------------
def _proj_kernel(x_ref, w_ref, b_ref, out_ref, *, num_head, dim_head, scale,
                 compute_dtype):
    x = x_ref[0]                                                     # (tile, D)
    y = jnp.dot(x, w_ref[...], preferred_element_type=jnp.float32) + b_ref[...]
    if scale != 1.0:
        y = y * scale                                                # fold 1/sqrt(dh) into Q
    t = y.shape[0]
    y = y.astype(compute_dtype).reshape(t, num_head, dim_head)
    out_ref[0] = jnp.swapaxes(y, 0, 1)                               # (H, tile, dh)


def _project_heads(x, w, b, *, num_head, dim_head, scale, compute_dtype,
                   tile, vmem_limit, single_buffer_weights):
    B, T, D = x.shape
    kernel = functools.partial(_proj_kernel, num_head=num_head, dim_head=dim_head,
                               scale=scale, compute_dtype=compute_dtype)
    return pl.pallas_call(
        kernel,
        out_shape=jax.ShapeDtypeStruct((B, num_head, T, dim_head), compute_dtype),
        grid=(B, T // tile),
        in_specs=[
            pl.BlockSpec((1, tile, D), lambda b, t: (b, t, 0)),
            _weight_spec((D, D), lambda b, t: (0, 0), single_buffer_weights),
            _weight_spec((1, D), lambda b, t: (0, 0), single_buffer_weights),
        ],
        out_specs=pl.BlockSpec((1, num_head, tile, dim_head),
                               lambda b, t: (b, 0, t, 0)),
        compiler_params=pltpu.CompilerParams(
            dimension_semantics=("parallel", "parallel"),
            vmem_limit_bytes=vmem_limit),
    )(x, w, b)


# ---------------------------------------------------------------------------
# Pass 2: head-batched flash attention + fused output projection
# ---------------------------------------------------------------------------
def _flash_kernel(q_ref, k_ref, v_ref, wo_ref, bo_ref, out_ref,
                  m_ref, l_ref, acc_ref, *, tk, kv_len, need_mask,
                  compute_dtype, exact_recip):
    ki = pl.program_id(2)
    nkv = pl.num_programs(2)
    cdt = compute_dtype

    @pl.when(ki == 0)
    def _():
        m_ref[...] = jnp.full_like(m_ref, _NEG_INF)
        l_ref[...] = jnp.zeros_like(l_ref)
        acc_ref[...] = jnp.zeros_like(acc_ref)

    q = q_ref[0]                    # (H, tq, dh) — already scaled, compute dtype
    k = k_ref[0]                    # (H, tk, dh) — already projected, head-major
    v = v_ref[0]                    # (H, tk, dh)

    s = jnp.einsum('hld,hsd->hls', q, k,
                   preferred_element_type=jnp.float32)               # (H, tq, tk) f32

    if need_mask:                   # static: only emitted when the kv axis was padded
        col = lax.broadcasted_iota(jnp.int32, s.shape, 2) + ki * tk
        s = jnp.where(col < kv_len, s, _NEG_INF)

    m_prev = m_ref[...]                                              # (H, tq)
    m_new = jnp.maximum(m_prev, jnp.max(s, axis=-1))
    alpha = jnp.exp(m_prev - m_new)                                  # (H, tq)
    p = jnp.exp(s - m_new[:, :, None])                               # (H, tq, tk)
    l_ref[...] = alpha * l_ref[...] + jnp.sum(p, axis=-1)
    acc_ref[...] = alpha[:, :, None] * acc_ref[...] + jnp.einsum(
        'hls,hsd->hld', p.astype(cdt), v, preferred_element_type=jnp.float32)
    m_ref[...] = m_new

    @pl.when(ki == nkv - 1)
    def _():
        # exact reciprocal on the f32 validation path, EUP approx on the bf16 path
        inv_l = pl.reciprocal(l_ref[...], approx=not exact_recip)    # (H, tq)
        ctx = acc_ref[...] * inv_l[:, :, None]                       # (H, tq, dh) f32
        h, tq, dh = ctx.shape
        ctx = jnp.swapaxes(ctx, 0, 1).reshape(tq, h * dh)            # (tq, D) — once/q-tile
        out = jnp.dot(ctx.astype(cdt), wo_ref[...],
                      preferred_element_type=jnp.float32) + bo_ref[...]
        out_ref[0] = out.astype(out_ref.dtype)


def _flash_attention(qp, kp, vp, wo, bo, *, out_dtype, tq, tk, kv_len,
                     compute_dtype, vmem_limit, single_buffer_weights,
                     exact_recip):
    B, H, Lp, dh = qp.shape
    Sp = kp.shape[2]
    D = H * dh
    nq, nkv = Lp // tq, Sp // tk
    need_mask = (Sp != kv_len)

    kernel = functools.partial(_flash_kernel, tk=tk, kv_len=kv_len,
                               need_mask=need_mask, compute_dtype=compute_dtype,
                               exact_recip=exact_recip)

    itemsize = jnp.dtype(compute_dtype).itemsize
    cost = pl.CostEstimate(
        flops=4 * B * H * Lp * Sp * dh + 2 * B * Lp * D * D,
        transcendentals=B * H * Lp * Sp,
        bytes_accessed=(qp.size + nq * (kp.size + vp.size) + wo.size) * itemsize
                       + bo.size * 4 + B * Lp * D * jnp.dtype(out_dtype).itemsize)

    return pl.pallas_call(
        kernel,
        out_shape=jax.ShapeDtypeStruct((B, Lp, D), out_dtype),
        grid=(B, nq, nkv),
        in_specs=[
            pl.BlockSpec((1, H, tq, dh), lambda b, qi, ki: (b, 0, qi, 0)),
            pl.BlockSpec((1, H, tk, dh), lambda b, qi, ki: (b, 0, ki, 0)),
            pl.BlockSpec((1, H, tk, dh), lambda b, qi, ki: (b, 0, ki, 0)),
            _weight_spec((D, D), lambda b, qi, ki: (0, 0), single_buffer_weights),
            _weight_spec((1, D), lambda b, qi, ki: (0, 0), single_buffer_weights),
        ],
        out_specs=pl.BlockSpec((1, tq, D), lambda b, qi, ki: (b, qi, 0)),
        scratch_shapes=[
            pltpu.VMEM((H, tq), jnp.float32),        # running max (2-D: no lane-1 padding)
            pltpu.VMEM((H, tq), jnp.float32),        # running sum
            pltpu.VMEM((H, tq, dh), jnp.float32),    # PV accumulator
        ],
        compiler_params=pltpu.CompilerParams(
            dimension_semantics=("parallel", "parallel", "arbitrary"),
            vmem_limit_bytes=vmem_limit),
        cost_estimate=cost,
    )(qp, kp, vp, wo, bo)


# ---------------------------------------------------------------------------
# Public wrapper (forward pass of the PyTorch AttentionLayer, attn_mask=None)
# ---------------------------------------------------------------------------
def _forward(query, key, value, params, num_head, *, compute_dtype,
             single_buffer_weights):
    B, L, D = query.shape
    _, S, _ = key.shape
    assert D % num_head == 0
    dh = D // num_head
    out_dtype = query.dtype
    cdt = compute_dtype

    wq, bq, wk, bk, wv, bv, wo, bo = prepare_params(params, cdt)

    cap, vmem_limit = _tpu_caps()
    tq = _seq_tile(L, cap)
    tk = _seq_tile(S, cap)
    Lp = _round_up(L, tq)
    Sp = _round_up(S, tk)

    # bf16 activations into the kernels: halves input DMA bytes and block VMEM.
    q_in = _pad_seq(query.astype(cdt), Lp)
    k_in = _pad_seq(key.astype(cdt), Sp)
    v_in = _pad_seq(value.astype(cdt), Sp)

    scale = 1.0 / math.sqrt(dh)
    proj = functools.partial(_project_heads, num_head=num_head, dim_head=dh,
                             compute_dtype=cdt, vmem_limit=vmem_limit,
                             single_buffer_weights=single_buffer_weights)
    qp = proj(q_in, wq, bq, scale=scale, tile=tq)   # (B, H, Lp, dh), scale folded in
    kp = proj(k_in, wk, bk, scale=1.0, tile=tk)     # (B, H, Sp, dh)
    vp = proj(v_in, wv, bv, scale=1.0, tile=tk)     # (B, H, Sp, dh)

    out = _flash_attention(qp, kp, vp, wo, bo, out_dtype=out_dtype, tq=tq, tk=tk,
                           kv_len=S, compute_dtype=cdt, vmem_limit=vmem_limit,
                           single_buffer_weights=single_buffer_weights,
                           exact_recip=(cdt == jnp.float32))
    if Lp != L:
        out = out[:, :L, :]
    return out


def attention_layer_forward(query, key, value, params, num_head,
                            compute_dtype=jnp.bfloat16):
    """Pallas implementation of AttentionLayer.forward (attn_mask=None)."""
    try:
        return _forward(query, key, value, params, num_head,
                        compute_dtype=compute_dtype, single_buffer_weights=True)
    except Exception:
        # Fallback if this Pallas build rejects pipeline_mode=pl.Buffered(1)
        # on the top-level pipeline: keep default double-buffered weights.
        return _forward(query, key, value, params, num_head,
                        compute_dtype=compute_dtype, single_buffer_weights=False)


# ---------------------------------------------------------------------------
# Plain-JAX reference + init, mirroring the PyTorch module
# ---------------------------------------------------------------------------
def _reference_forward(query, key, value, params, num_head):
    wq, bq, wk, bk, wv, bv, wo, bo = params
    B, L, D = query.shape
    _, S, _ = key.shape
    dh = D // num_head
    q = (query @ wq + bq).reshape(B, L, num_head, dh)
    k = (key @ wk + bk).reshape(B, S, num_head, dh)
    v = (value @ wv + bv).reshape(B, S, num_head, dh)
    s = jnp.einsum("blhd,bshd->bhls", q, k) / math.sqrt(dh)
    p = jax.nn.softmax(s, axis=-1)
    o = jnp.einsum("bhls,bshd->blhd", p, v).reshape(B, L, D)
    return o @ wo + bo


def init_params(key, d_model):
    """Deterministic nn.Linear-style init; weights stored as (in, out)."""
    ks = jax.random.split(key, 8)
    bound = 1.0 / math.sqrt(d_model)

    def lin(kw, kb):
        w = jax.random.uniform(kw, (d_model, d_model), jnp.float32, -bound, bound)
        b = jax.random.uniform(kb, (1, d_model), jnp.float32, -bound, bound)
        return w, b

    wq, bq = lin(ks[0], ks[1])
    wk, bk = lin(ks[2], ks[3])
    wv, bv = lin(ks[4], ks[5])
    wo, bo = lin(ks[6], ks[7])
    return (wq, bq, wk, bk, wv, bv, wo, bo)


if __name__ == "__main__":
    B, L, S, d_model, num_head = 2, 8, 8, 32, 4  # L == S (forward views out as (B, S, -1))

    root = jax.random.PRNGKey(0)
    k_params, k_q, k_k, k_v = jax.random.split(root, 4)

    params = init_params(k_params, d_model)
    query = jax.random.normal(k_q, (B, L, d_model), jnp.float32)
    key_t = jax.random.normal(k_k, (B, S, d_model), jnp.float32)
    value = jax.random.normal(k_v, (B, S, d_model), jnp.float32)

    ref = _reference_forward(query, key_t, value, params, num_head)

    # f32 compute path: tight semantic check (exact reciprocal, no bf16 rounding).
    out_f32 = jax.block_until_ready(
        attention_layer_forward(query, key_t, value, params, num_head,
                                compute_dtype=jnp.float32))
    assert out_f32.shape == (B, L, d_model)
    assert jnp.allclose(out_f32, ref, atol=1e-2, rtol=1e-2), "f32 mismatch vs reference"

    # bf16 compute path (default, MXU-native): params pre-cast once and reused.
    params_bf16 = prepare_params(params, jnp.bfloat16)
    out_bf16 = jax.block_until_ready(
        attention_layer_forward(query, key_t, value, params_bf16, num_head))
    assert out_bf16.shape == (B, L, d_model)
    assert jnp.allclose(out_bf16, ref, atol=8e-2, rtol=8e-2), "bf16 mismatch vs reference"

    # Awkward length: exercises sequence padding + in-kernel padded-key masking.
    L2 = S2 = 20
    q2 = jax.random.normal(jax.random.PRNGKey(1), (B, L2, d_model), jnp.float32)
    k2 = jax.random.normal(jax.random.PRNGKey(2), (B, S2, d_model), jnp.float32)
    v2 = jax.random.normal(jax.random.PRNGKey(3), (B, S2, d_model), jnp.float32)
    ref2 = _reference_forward(q2, k2, v2, params, num_head)
    out2 = jax.block_until_ready(
        attention_layer_forward(q2, k2, v2, params, num_head,
                                compute_dtype=jnp.float32))
    assert out2.shape == (B, L2, d_model)
    assert jnp.allclose(out2, ref2, atol=1e-2, rtol=1e-2), "padded-length mismatch"

    print("KERNEL_OK")
</pallas_src>

<mosaic_0001>
module attributes {stable_mosaic.version = 11 : i64} {
  func.func @_proj_kernel(%arg0: i32, %arg1: i32, %arg2: memref<1x8x32xf32, #tpu.memory_space<vmem>>, %arg3: memref<32x32xf32, #tpu.memory_space<vmem>>, %arg4: memref<1x32xf32, #tpu.memory_space<vmem>>, %arg5: memref<1x4x8x8xf32, #tpu.memory_space<vmem>>) attributes {dimension_semantics = [#tpu.dimension_semantics<parallel>, #tpu.dimension_semantics<parallel>], iteration_bounds = array<i64: 2, 1>, scalar_prefetch = 0 : i64, scratch_operands = 0 : i64, tpu.core_type = #tpu.core_type<tc>, window_params = [{transform_indices = @transform_0, window_bounds = array<i64: 1, 8, 32>}, {pipeline_mode = #tpu.pipeline_mode<synchronous>, transform_indices = @transform_1, window_bounds = array<i64: 32, 32>}, {pipeline_mode = #tpu.pipeline_mode<synchronous>, transform_indices = @transform_2, window_bounds = array<i64: 1, 32>}, {transform_indices = @transform_3, window_bounds = array<i64: 1, 4, 8, 8>}]} {
    %c0 = arith.constant 0 : index
    %c0_0 = arith.constant 0 : index
    %c0_1 = arith.constant 0 : index
    %0 = vector.load %arg2[%c0, %c0_0, %c0_1] : memref<1x8x32xf32, #tpu.memory_space<vmem>>, vector<1x8x32xf32>
    %1 = vector.shape_cast %0 : vector<1x8x32xf32> to vector<8x32xf32>
    %c0_2 = arith.constant 0 : index
    %c0_3 = arith.constant 0 : index
    %2 = vector.load %arg3[%c0_2, %c0_3] : memref<32x32xf32, #tpu.memory_space<vmem>>, vector<32x32xf32>
    %cst = arith.constant dense<0.000000e+00> : vector<8x32xf32>
    %3 = tpu.matmul %1, %2, %cst {dimension_numbers = #tpu.dot_dimension_numbers<[1], [0], [0], [1], [0, 0, 1, 1], [], []>} : vector<8x32xf32>, vector<32x32xf32>, vector<8x32xf32> -> vector<8x32xf32>
    %c0_4 = arith.constant 0 : index
    %c0_5 = arith.constant 0 : index
    %4 = vector.load %arg4[%c0_4, %c0_5] : memref<1x32xf32, #tpu.memory_space<vmem>>, vector<1x32xf32>
    %5 = vector.broadcast %4 : vector<1x32xf32> to vector<8x32xf32>
    %6 = arith.addf %3, %5 : vector<8x32xf32>
    %cst_6 = arith.constant 0.353553385 : f32
    %7 = vector.broadcast %cst_6 : f32 to vector<8x32xf32>
    %8 = arith.mulf %6, %7 : vector<8x32xf32>
    %9 = vector.shape_cast %8 : vector<8x32xf32> to vector<8x4x8xf32>
    %10 = tpu.transpose %9, [1, 0, 2] : vector<8x4x8xf32> -> vector<4x8x8xf32>
    %c0_7 = arith.constant 0 : index
    %c0_8 = arith.constant 0 : index
    %c0_9 = arith.constant 0 : index
    %c0_10 = arith.constant 0 : index
    %11 = vector.load %arg5[%c0_7, %c0_8, %c0_9, %c0_10] : memref<1x4x8x8xf32, #tpu.memory_space<vmem>>, vector<1x4x8x8xf32>
    %12 = vector.shape_cast %11 : vector<1x4x8x8xf32> to vector<4x8x8xf32>
    %13 = vector.shape_cast %10 : vector<4x8x8xf32> to vector<1x4x8x8xf32>
    tpu.vector_store %arg5[%c0_7, %c0_8, %c0_9, %c0_10], %13 {strides = array<i32>} : memref<1x4x8x8xf32, #tpu.memory_space<vmem>>, vector<1x4x8x8xf32>,
    return
  }
  func.func @transform_0(%arg0: i32, %arg1: i32) -> (i32, i32, i32) {
    %c0_i32 = arith.constant 0 : i32
    %c0_i32_0 = arith.constant 0 : i32
    return %arg0, %arg1, %c0_i32 : i32, i32, i32
  }
  func.func @transform_1(%arg0: i32, %arg1: i32) -> (i32, i32) {
    %c0_i32 = arith.constant 0 : i32
    %c0_i32_0 = arith.constant 0 : i32
    %c0_i32_1 = arith.constant 0 : i32
    return %c0_i32, %c0_i32_0 : i32, i32
  }
  func.func @transform_2(%arg0: i32, %arg1: i32) -> (i32, i32) {
    %c0_i32 = arith.constant 0 : i32
    %c0_i32_0 = arith.constant 0 : i32
    %c0_i32_1 = arith.constant 0 : i32
    return %c0_i32, %c0_i32_0 : i32, i32
  }
  func.func @transform_3(%arg0: i32, %arg1: i32) -> (i32, i32, i32, i32) {
    %c0_i32 = arith.constant 0 : i32
    %c0_i32_0 = arith.constant 0 : i32
    %c0_i32_1 = arith.constant 0 : i32
    return %arg0, %c0_i32, %arg1, %c0_i32_0 : i32, i32, i32, i32
  }
}

module attributes {stable_mosaic.version = 11 : i64} {
  func.func @_proj_kernel(%arg0: i32, %arg1: i32, %arg2: memref<1x8x32xf32, #tpu.memory_space<vmem>>, %arg3: memref<32x32xf32, #tpu.memory_space<vmem>>, %arg4: memref<1x32xf32, #tpu.memory_space<vmem>>, %arg5: memref<1x4x8x8xf32, #tpu.memory_space<vmem>>) attributes {dimension_semantics = [#tpu.dimension_semantics<parallel>, #tpu.dimension_semantics<parallel>], iteration_bounds = array<i64: 2, 1>, scalar_prefetch = 0 : i64, scratch_operands = 0 : i64, tpu.core_type = #tpu.core_type<tc>, window_params = [{transform_indices = @transform_0, window_bounds = array<i64: 1, 8, 32>}, {pipeline_mode = #tpu.pipeline_mode<synchronous>, transform_indices = @transform_1, window_bounds = array<i64: 32, 32>}, {pipeline_mode = #tpu.pipeline_mode<synchronous>, transform_indices = @transform_2, window_bounds = array<i64: 1, 32>}, {transform_indices = @transform_3, window_bounds = array<i64: 1, 4, 8, 8>}]} {
    %c0 = arith.constant 0 : index
    %c0_0 = arith.constant 0 : index
    %c0_1 = arith.constant 0 : index
    %0 = vector.load %arg2[%c0, %c0_0, %c0_1] : memref<1x8x32xf32, #tpu.memory_space<vmem>>, vector<1x8x32xf32>
    %1 = vector.shape_cast %0 : vector<1x8x32xf32> to vector<8x32xf32>
    %c0_2 = arith.constant 0 : index
    %c0_3 = arith.constant 0 : index
    %2 = vector.load %arg3[%c0_2, %c0_3] : memref<32x32xf32, #tpu.memory_space<vmem>>, vector<32x32xf32>
    %cst = arith.constant dense<0.000000e+00> : vector<8x32xf32>
    %3 = tpu.matmul %1, %2, %cst {dimension_numbers = #tpu.dot_dimension_numbers<[1], [0], [0], [1], [0, 0, 1, 1], [], []>} : vector<8x32xf32>, vector<32x32xf32>, vector<8x32xf32> -> vector<8x32xf32>
    %c0_4 = arith.constant 0 : index
    %c0_5 = arith.constant 0 : index
    %4 = vector.load %arg4[%c0_4, %c0_5] : memref<1x32xf32, #tpu.memory_space<vmem>>, vector<1x32xf32>
    %5 = vector.broadcast %4 : vector<1x32xf32> to vector<8x32xf32>
    %6 = arith.addf %3, %5 : vector<8x32xf32>
    %cst_6 = arith.constant 0.353553385 : f32
    %7 = vector.broadcast %cst_6 : f32 to vector<8x32xf32>
    %8 = arith.mulf %6, %7 : vector<8x32xf32>
    %9 = vector.shape_cast %8 : vector<8x32xf32> to vector<8x4x8xf32>
    %10 = tpu.transpose %9, [1, 0, 2] : vector<8x4x8xf32> -> vector<4x8x8xf32>
    %c0_7 = arith.constant 0 : index
    %c0_8 = arith.constant 0 : index
    %c0_9 = arith.constant 0 : index
    %c0_10 = arith.constant 0 : index
    %11 = vector.load %arg5[%c0_7, %c0_8, %c0_9, %c0_10] : memref<1x4x8x8xf32, #tpu.memory_space<vmem>>, vector<1x4x8x8xf32>
    %12 = vector.shape_cast %11 : vector<1x4x8x8xf32> to vector<4x8x8xf32>
    %13 = vector.shape_cast %10 : vector<4x8x8xf32> to vector<1x4x8x8xf32>
    tpu.vector_store %arg5[%c0_7, %c0_8, %c0_9, %c0_10], %13 {strides = array<i32>} : memref<1x4x8x8xf32, #tpu.memory_space<vmem>>, vector<1x4x8x8xf32>,
    return
  }
  func.func @transform_0(%arg0: i32, %arg1: i32) -> (i32, i32, i32) {
    %c0_i32 = arith.constant 0 : i32
    %c0_i32_0 = arith.constant 0 : i32
    return %arg0, %arg1, %c0_i32 : i32, i32, i32
  }
  func.func @transform_1(%arg0: i32, %arg1: i32) -> (i32, i32) {
    %c0_i32 = arith.constant 0 : i32
    %c0_i32_0 = arith.constant 0 : i32
    %c0_i32_1 = arith.constant 0 : i32
    return %c0_i32, %c0_i32_0 : i32, i32
  }
  func.func @transform_2(%arg0: i32, %arg1: i32) -> (i32, i32) {
    %c0_i32 = arith.constant 0 : i32
    %c0_i32_0 = arith.constant 0 : i32
    %c0_i32_1 = arith.constant 0 : i32
    return %c0_i32, %c0_i32_0 : i32, i32
  }
  func.func @transform_3(%arg0: i32, %arg1: i32) -> (i32, i32, i32, i32) {
    %c0_i32 = arith.constant 0 : i32
    %c0_i32_0 = arith.constant 0 : i32
    %c0_i32_1 = arith.constant 0 : i32
    return %arg0, %c0_i32, %arg1, %c0_i32_0 : i32, i32, i32, i32
  }
}

</mosaic_0001>

<bundles_post_ra>
// kernel: tpu_custom_call.1
= control target key start
LH: loop header
LB: loop body
LE: loop exit
PB: predicated region body
PF: predicated region fallthrough
CT: control target
= control target key end

     0   :  { %8 = vsyncpa [#allocation3], 0  ;;  %s1045_s0 = inlined_call_operand.hbm [shape: f32[2,8,32], index: 0, kind: input, shape index: {}]   ;;  %s1046_s1 = inlined_call_operand.hbm [shape: f32[32,32], index: 1, kind: input, shape index: {}]   ;;  %s1047_s2 = inlined_call_operand.vmem [shape: f32[1,32], index: 2, kind: input, shape index: {}]   ;;  %s1048_s3 = inlined_call_operand.hbm [shape: f32[2,4,8,8], index: 3, kind: output, shape index: {}]  }
   0x1   :  { %10 = vsyncpa [#allocation3 + $0x1], 0 }
   0x2   :  { %11 = vsyncpa [#allocation6], 0 }
   0x3   :  { %12 = vsyncpa [#allocation4], 0 }
   0x4   :  { %14 = vsyncpa [#allocation4 + $0x1], 0  ;;  %s860_s12 = smov 0   ;;  %s862_s13 = smov 0  }
   0x5   :  { %s864_s14 = smov 0   ;;  %s866_s15 = smov 0  }
   0x6   :  { %s868_s16 = smov 0   ;;  %s870_s17 = smov 0  }
   0x7 LB: > { %s565_s18 = sadd.s32 4294967295, %s824_s17   ;;  %s566_s19 = sadd.s32 4294967294, %s824_s17   ;;  %s824_s17 = sphi %s870_s17, %s20_s17   ;;  %s820_s16 = sphi %s868_s16, %s1066_s16   ;;  %s816_s15 = sphi %s866_s15, %s1065_s15   ;;  %s812_s14 = sphi %s864_s14, %s1064_s14   ;;  %s808_s13 = sphi %s862_s13, %s1063_s13   ;;  %s804_s12 = sphi %s860_s12, %s1062_s12  }
   0x8   : > { %p54_p0 = scmp.ne.s32.totalorder %s808_s13, %s804_s12  ;;  %p894_p1 = scmp.eq.s32.totalorder %s565_s18, 0 }
   0x9   : > { %p898_p2 = scmp.eq.s32.totalorder %s565_s18, 1  ;;  %p128_p3 = scmp.eq.s32.totalorder %s566_s19, 1 }
   0xa   : > { %p904_p4 = por %p894_p1, %p54_p0  ;;  %p567_p5 = scmp.ge.s32.totalorder %s824_s17, 1 }
   0xb   : > { %p909_p6 = por %p128_p3, %p54_p0  ;;  %p135_p7 = scmp.lt.s32.totalorder %s824_s17, 3 }
   0xc   : > { %s1052_s22 = scalar_select %p904_p4, 1, 0 }
   0xd   : > { %s1053_s23 = scalar_select %p909_p6, 1, 0 }
   0xe   : > { %p914_p8 = pnand %p567_p5, %p135_p7  ;;  %s826_s25 = smov [#allocation5]  }
   0xf   : > { %s147_s26 = sshll.u32 %s826_s25, 4  ;;  %s32_s28 = sadd.s32 1, %s820_s16  ;;  %s148_s26 = int_to_ptr.vmem [resolvable:$true] %s147_s26 }
  0x10   : > { %p610_p9 = pneg %p914_p8  ;;  %s697_s29 = scalar_lea.vmem %s148_s26, 512 }
  0x11   : > { %p698_p13 = scmp.ne.s32.totalorder %s148_s26, %s697_s29  ;;  %p705_p5 = scmp.lt.s32.totalorder %s148_s26, %s148_s26 }
  0x12   : > { %p923_p11 = pnand %p610_p9, %p894_p1  ;;  %p706_p7 = scmp.lt.s32.totalorder %s697_s29, %s697_s29 }
  0x14   : > { %p688_p12 = pneg %p923_p11  ;;  %p707_p6 = por %p706_p7, %p705_p5 }
  0x16   : > { %p700_p0 = pnand %p698_p13, %p688_p12 }
  0x18   : > { %p701_p3 = pneg %p700_p0 }
  0x1a   : > { %p708_p4 = pnand %p707_p6, %p701_p3 }
  0x1c   : > { %711 = shalt.err (!%p708_p4)
}
  0x1d   : > { %s827_s30 = smov 128   ;;  %s828_s4 = smov 8  }
  0x1e   : > { %613 = dma.hbm_to_vmem [thread:$0]  (!%p923_p11), %s1046_s1, 512, %s148_s26, [#allocation6], %s827_s30, %s827_s30, %s828_s4  }
  0x1f   : > { %p34_p6 = scmp.ge.s32.totalorder %s32_s28, 2  ;;  %s41_s7 = sadd.s32 1, %s812_s14 }
  0x20   : > { %p48_p4 = scmp.ne.s32.totalorder %s812_s14, %s808_s13  ;;  %p49_p9 = scmp.eq.s32.totalorder %s824_s17, 0 }
  0x21   : > { %s1068_s28 = smov (%p34_p6, %s32_s28), 0  ;;  %p623_p0 = scmp.lt.s32.totalorder %s824_s17, 2 }
  0x22   : > { %p941_p12 = por %p49_p9, %p48_p4  ;;  %p947_p13 = por %p898_p2, %p48_p4 }
  0x23   : > { %s36_s10 = ssub.s32 %s820_s16, %s1068_s28  ;;  %s164_s11 = sand.u32 1, %s812_s14  }
  0x24   : > { %p39_p11 = scmp.eq.s32.totalorder %s36_s10, 0  ;;  %s570_s18 = sshll.u32 %s164_s11, 3 }
  0x25   : > { %s571_s25 = sshll.u32 %s820_s16, 7  ;;  %s168_s30 = scalar_lea.vmem [#allocation2], %s570_s18 }
  0x26   : > { %s956_s19 = scalar_select %p39_p11, %s812_s14, %s41_s7  }
  0x27   : > { %s174_s29 = scalar_lea.hbm %s1045_s0, %s571_s25  ;;  %s176_s4 = sshll.u32 %s168_s30, 4  ;;  %s177_s4 = int_to_ptr.vmem [resolvable:$true] %s176_s4 }
  0x28   : > { %p964_p2 = pnand %p623_p0, %p941_p12  ;;  %s165_s5 = scalar_lea.sflag [#allocation3], %s164_s11 }
  0x29   : > { %s725_s6 = scalar_lea.vmem %s177_s4, 128  ;;  %s829_s7 = smov [#allocation2]  }
  0x2a   : > { %p714_p3 = pneg %p964_p2  ;;  %p726_p5 = scmp.ne.s32.totalorder %s177_s4, %s725_s6 }
  0x2b   : > { %s730_s10 = sshll.u32 %s829_s7, 4  ;;  %s731_s10 = int_to_ptr.vmem [resolvable:$false] %s730_s10 }
  0x2c   : > { %p728_p7 = pnand %p726_p5, %p714_p3  ;;  %s732_s25 = scalar_lea.vmem %s731_s10, 256 }
  0x2d   : > { %p733_p4 = scmp.lt.s32.totalorder %s177_s4, %s731_s10  ;;  %p734_p9 = scmp.lt.s32.totalorder %s732_s25, %s725_s6 }
  0x2e   : > { %p729_p6 = pneg %p728_p7 }
  0x2f   : > { %p735_p11 = por %p734_p9, %p733_p4 }
  0x31   : > { %p736_p10 = pnand %p735_p11, %p729_p6 }
  0x33   : > { %739 = shalt.err (!%p736_p10)
}
  0x34   : > { %617 = dma.hbm_to_vmem [thread:$0]  (!%p964_p2), %s174_s29, 128, %s177_s4, %s165_s5  }
  0x35   : > { %185 = sbr.rel (%p914_p8) target bundleno = 419 (0x1a3), region = 32  ;;  %s975_s8 = sand.u32 (!%p914_p8), 1, %s808_s13  }
  0x36   : > { %s573_s11 = sshll.u32 (!%p914_p8), %s975_s8, 3  ;;  %s188_s18 = scalar_lea.sflag (!%p914_p8), [#allocation3], %s975_s8 }
  0x37   : > { %s191_s26 = scalar_lea.vmem (!%p914_p8), [#allocation2], %s573_s11  ;;  %p1059_p12 = scmp.ne.s32.totalorder (!%p914_p8), %s1052_s22, 0 }
  0x3a   : > { %791 = dma.done.wait (%p1059_p12), %s188_s18, 128  }
  0x3b   : > { %793 = vsyncadd (%p1059_p12), %s188_s18, 4294967168 }
  0x3c   : > { %795 = dma.done.wait (%p894_p1), [#allocation6], 512  }
  0x3d   : > { %797 = vsyncadd (%p894_p1), [#allocation6], 4294966784  ;;  %v830_v0 = vmov 0.0   ;;  %vm831_vm0 = vmmov 0   ;;  %v222_v1 = vld [vmem:[#allocation5 + $0x18] sm:$0xff]  ;;  %v221_v2 = vld [vmem:[#allocation5 + $0x10] sm:$0xff]  ;;  %v320_v13 = vlaneseq }
  0x3e   : > { %591 = vmatprep.subr.mxu0 %v830_v0  ;;  %599 = vmatprep.mubr.msk.f32.mxu0 %vm831_vm0, %v830_v0  ;;  %v220_v3 = vld [vmem:[#allocation5 + $0x8] sm:$0xff]  ;;  %v219_v4 = vld [vmem:[#allocation5] sm:$0xff]  ;;  %v218_v5 = vld [vmem:[%s191_s26] sm:$0xff]  ;;  %vm230_vm1 = vcmask 261120   ;;  %s832_s24 = smov 104   ;;  %s833_s27 = smov 120  }
  0x3f   : > { %592 = vmatpush3.msra.mxu0 %v222_v1  ;;  %v576_v6 = vld [vmem:[%s1047_s2] ss:$0 sm:$0xff]  ;;  %s834_s29 = smov 112   ;;  %v835_v11 = vmov 1983009808   ;;  %v321_v17 = vshrl.u32 %v320_v13, 7 }
  0x40   : > { %593 = vmatprep.subr.mxu0 %v830_v0  ;;  %v318_v12 = vunpack.c.l.s4 %v835_v11  ;;  %v836_v14 = vmov 1934713408   ;;  %s575_s30 = sshll.u32 %s975_s8, 5  ;;  %s585_s4 = sshll.u32 %s816_s15, 9  ;;  %vm451_vm2 = vcmask 64512  }
  0x41   : > { %594 = vmatpush3.msra.mxu0 %v221_v2  ;;  %v350_v15 = vunpack.c.l.s4 %v836_v14  ;;  %s217_s21 = scalar_lea.vmem [#allocation7], %s575_s30  ;;  %s995_s10 = scalar_lea.hbm %s1048_s3, %s585_s4 }
  0x42   : > { %595 = vmatprep.subr.mxu0 %v830_v0  ;;  %v319_v16 = vunpack.c.0.s8 %v318_v12  ;;  %s471_s5 = sshll.u32 %s217_s21, 4  ;;  %s457_s15 = scalar_lea.sflag [#allocation4], %s975_s8  ;;  %s997_s5 = int_to_ptr.vmem [resolvable:$true] %s471_s5 }
  0x43   : > { %596 = vmatpush3.msra.mxu0 %v220_v3  ;;  %v351_v20 = vunpack.c.0.s8 %v350_v15  ;;  %s740_s25 = scalar_lea.vmem %s997_s5, 512  ;;  %s837_s11 = smov [#allocation7]  }
  0x44   : > { %597 = vmatprep.subr.mxu0 %v830_v0  ;;  %v322_v21 = vsub.s32 %v319_v16, %v321_v17  ;;  %p741_p1 = scmp.ne.s32.totalorder %s997_s5, %s740_s25  ;;  %s744_s18 = sshll.u32 %s837_s11, 4  ;;  %s745_s18 = int_to_ptr.vmem [resolvable:$false] %s744_s18 }
  0x45   : > { %598 = vmatpush3.msra.mxu0 %v219_v4  ;;  %v354_v27 = vsub.s32 %v351_v20, %v321_v17  ;;  %s746_s26 = scalar_lea.vmem %s745_s18, 1024  ;;  %p747_p0 = scmp.lt.s32.totalorder %s997_s5, %s745_s18 }
  0x46   : > { %600 = vmatmul.mubr.msk.f32.vlgmr.msra.gmra.mxu0 %vm230_vm1, %v218_v5  ;;  %p742_p8 = pnand %p741_p1, %p947_p13  ;;  %p748_p2 = scmp.lt.s32.totalorder %s746_s26, %s740_s25 }
  0x48   : > { %p743_p10 = pneg %p742_p8  ;;  %p749_p3 = por %p748_p2, %p747_p0 }
  0x4a   : > { %p750_p5 = pnand %p749_p3, %p743_p10 }
 0x106   : > { %v300_v7 = vpop.f32.mrf.mxu0 }
 0x107   : > { %v301_v8 = vadd.f32 %v576_v6, %v300_v7 }
 0x108   : > { %v601_v9 = vpop.f32.mrf.mxu0 }
 0x109   : > { %v304_v10 = vmul.f32 0.35355338, %v301_v8 }
 0x10b   : > { %312 = vrot.lane.b32.xlu1 %v304_v10, %s832_s24  ;;  %306 = vrot.lane.b32.xlu0 %v304_v10, %s833_s27 }
 0x10f   : > { %309 = vrot.lane.b32.xlu0 %v304_v10, %s834_s29 }
 0x17d   : > { %v313_v18 = vpop.permute.xlu1 %312  ;;  %v307_v19 = vpop.permute.xlu0 %306 }
 0x17e   : > { %v331_v22 = vcombine.low %v307_v19, %v313_v18  ;;  %v332_v23 = vcombine.high %v307_v19, %v313_v18 }
 0x180   : > { %v339_v28 = vrot.slane %v331_v22, %v322_v21  ;;  %v346_v29 = vrot.slane %v332_v23, %v322_v21 }
 0x181   : > { %v310_v24 = vpop.permute.xlu0 %309 }
 0x182   : > { %v315_v25 = vcombine.low %v304_v10, %v310_v24  ;;  %v316_v26 = vcombine.high %v304_v10, %v310_v24 }
 0x184   : > { %v323_v30 = vrot.slane %v315_v25, %v322_v21  ;;  %v330_v31 = vrot.slane %v316_v26, %v322_v21 }
 0x186   : > { %v347_v32 = vcombine.low %v323_v30, %v339_v28  ;;  %v348_v33 = vcombine.high %v323_v30, %v339_v28  ;;  %v363_v34 = vcombine.low %v330_v31, %v346_v29  ;;  %v364_v35 = vcombine.high %v330_v31, %v346_v29 }
 0x188   : > { %v355_v36 = vrot.slane %v347_v32, %v354_v27  ;;  %v362_v37 = vrot.slane %v348_v33, %v354_v27  ;;  %v371_v38 = vrot.slane %v363_v34, %v354_v27  ;;  %v378_v39 = vrot.slane %v364_v35, %v354_v27 }
 0x18a   : > { %v383_v40 = vcombine.low %v355_v36, %v362_v37  ;;  %v578_v41 = vcombine.high %v355_v36, %v362_v37  ;;  %v399_v42 = vcombine.low %v371_v38, %v378_v39  ;;  %v579_v43 = vcombine.high %v371_v38, %v378_v39 }
 0x18c   : > { %v390_v44 = vrot.slane %v383_v40, %v322_v21  ;;  %v398_v45 = vrot.slane %v578_v41, %v322_v21  ;;  %v406_v46 = vrot.slane %v399_v42, %v322_v21  ;;  %v414_v47 = vrot.slane %v579_v43, %v322_v21 }
 0x18e   : > { %v415_v48 = vcombine.low %v390_v44, %v398_v45  ;;  %v416_v49 = vcombine.high %v390_v44, %v398_v45  ;;  %v431_v50 = vcombine.low %v406_v46, %v414_v47  ;;  %v432_v51 = vcombine.high %v406_v46, %v414_v47 }
 0x190   : > { %v423_v52 = vrot.slane %v415_v48, %v354_v27  ;;  %v430_v53 = vrot.slane %v416_v49, %v354_v27  ;;  %v439_v54 = vrot.slane %v431_v50, %v354_v27  ;;  %v446_v55 = vrot.slane %v432_v51, %v354_v27 }
 0x192   : > { %v447_v56 = vcombine.low %v423_v52, %v439_v54  ;;  %v448_v57 = vcombine.high %v423_v52, %v439_v54  ;;  %v449_v58 = vcombine.low %v430_v53, %v446_v55  ;;  %v450_v59 = vcombine.high %v430_v53, %v446_v55 }
 0x194   : > { %452 = vst.msk [vmem:[%s217_s21] sm:$0xff] %vm451_vm2, %v447_v56  ;;  %453 = vst.msk [vmem:[%s217_s21 + $0x8] sm:$0xff] %vm451_vm2, %v448_v57 }
 0x195   : > { %454 = vst.msk [vmem:[%s217_s21 + $0x10] sm:$0xff] %vm451_vm2, %v449_v58  ;;  %455 = vst.msk [vmem:[%s217_s21 + $0x18] sm:$0xff] %vm451_vm2, %v450_v59 }
 0x196   : > { %753 = shalt.err (!%p750_p5)
}
 0x197   : > { %s754_s20 = scalar_lea.hbm %s995_s10, 512  ;;  %s758_s27 = scalar_lea.hbm %s1048_s3, 1024 }
 0x198   : > { %p755_p7 = scmp.ne.s32.totalorder %s995_s10, %s754_s20  ;;  %p759_p9 = scmp.lt.s32.totalorder %s995_s10, %s1048_s3 }
 0x199   : > { %p760_p11 = scmp.lt.s32.totalorder %s758_s27, %s754_s20 }
 0x19a   : > { %p756_p6 = pnand %p755_p7, %p947_p13 }
 0x19b   : > { %p761_p12 = por %p760_p11, %p759_p9 }
 0x19c   : > { %p757_p4 = pneg %p756_p6 }
 0x19e   : > { %p762_p1 = pnand %p761_p12, %p757_p4 }
 0x1a0   : > { %765 = shalt.err (!%p762_p1)
}
 0x1a1   : > { %s838_s4 = smov 128   ;;  %s839_s21 = smov 8  }
 0x1a2   : > { %608 = dma.vmem_to_hbm [thread:$0]  (%p947_p13), %s997_s5, 512, %s995_s10, %s457_s15, %s838_s4, %s838_s4, %s839_s21  }
 0x1a3 PF: > { %s486_s6 = sand.u32 1, %s804_s12   ;;  %p1060_p8 = scmp.ne.s32.totalorder %s1053_s23, 0 }
 0x1a4   : > { %p1061_p10 = scmp.ge.s32.totalorder %s824_s17, 2  ;;  %s487_s7 = scalar_lea.sflag [#allocation4], %s486_s6 }
 0x1a6   : > { %p619_p0 = pnand %p1061_p10, %p1060_p8 }
 0x1a8   : > { %p620_p2 = pneg %p619_p0 }
 0x1aa   : > { %799 = dma.done.wait (%p620_p2), %s487_s7, 512  }
 0x1ab   : > { %801 = vsyncadd (%p620_p2), %s487_s7, 4294966784  ;;  %s20_s17 = sadd.s32 1, %s824_s17   ;;  %s1062_s12 = smov %s808_s13 }
 0x1ac   : > { %p17_p3 = scmp.ge.s32.totalorder %s20_s17, 4   ;;  %s1063_s13 = smov %s812_s14 }
 0x1ad   : > { %s1064_s14 = smov %s956_s19  ;;  %s1065_s15 = smov %s820_s16 }
 0x1ae   : > { %s1066_s16 = smov %s1068_s28  ;;  %19 = sbr.rel (!%p17_p3) target bundleno = 7 (0x7), region = 81 }
 0x1b3   :  { %492 = vsyncpa [#allocation3], 1 }
 0x1b4   :  { %494 = vsyncpa [#allocation3 + $0x1], 1 }
 0x1b5   :  { %495 = vsyncpa [#allocation6], 1 }
 0x1b6   :  { %496 = vsyncpa [#allocation4], 1 }
 0x1b7   :  { %498 = vsyncpa [#allocation4 + $0x1], 1 }

// kernel: tpu_custom_call.1
= control target key start
LH: loop header
LB: loop body
LE: loop exit
PB: predicated region body
PF: predicated region fallthrough
CT: control target
= control target key end

     0   :  { %8 = vsyncpa [#allocation3], 0  ;;  %s1045_s0 = inlined_call_operand.hbm [shape: f32[2,8,32], index: 0, kind: input, shape index: {}]   ;;  %s1046_s1 = inlined_call_operand.hbm [shape: f32[32,32], index: 1, kind: input, shape index: {}]   ;;  %s1047_s2 = inlined_call_operand.vmem [shape: f32[1,32], index: 2, kind: input, shape index: {}]   ;;  %s1048_s3 = inlined_call_operand.hbm [shape: f32[2,4,8,8], index: 3, kind: output, shape index: {}]  }
   0x1   :  { %10 = vsyncpa [#allocation3 + $0x1], 0 }
   0x2   :  { %11 = vsyncpa [#allocation6], 0 }
   0x3   :  { %12 = vsyncpa [#allocation4], 0 }
   0x4   :  { %14 = vsyncpa [#allocation4 + $0x1], 0  ;;  %s860_s12 = smov 0   ;;  %s862_s13 = smov 0  }
   0x5   :  { %s864_s14 = smov 0   ;;  %s866_s15 = smov 0  }
   0x6   :  { %s868_s16 = smov 0   ;;  %s870_s17 = smov 0  }
   0x7 LB: > { %s565_s18 = sadd.s32 4294967295, %s824_s17   ;;  %s566_s19 = sadd.s32 4294967294, %s824_s17   ;;  %s824_s17 = sphi %s870_s17, %s20_s17   ;;  %s820_s16 = sphi %s868_s16, %s1066_s16   ;;  %s816_s15 = sphi %s866_s15, %s1065_s15   ;;  %s812_s14 = sphi %s864_s14, %s1064_s14   ;;  %s808_s13 = sphi %s862_s13, %s1063_s13   ;;  %s804_s12 = sphi %s860_s12, %s1062_s12  }
   0x8   : > { %p54_p0 = scmp.ne.s32.totalorder %s808_s13, %s804_s12  ;;  %p894_p1 = scmp.eq.s32.totalorder %s565_s18, 0 }
   0x9   : > { %p898_p2 = scmp.eq.s32.totalorder %s565_s18, 1  ;;  %p128_p3 = scmp.eq.s32.totalorder %s566_s19, 1 }
   0xa   : > { %p904_p4 = por %p894_p1, %p54_p0  ;;  %p567_p5 = scmp.ge.s32.totalorder %s824_s17, 1 }
   0xb   : > { %p909_p6 = por %p128_p3, %p54_p0  ;;  %p135_p7 = scmp.lt.s32.totalorder %s824_s17, 3 }
   0xc   : > { %s1052_s22 = scalar_select %p904_p4, 1, 0 }
   0xd   : > { %s1053_s23 = scalar_select %p909_p6, 1, 0 }
   0xe   : > { %p914_p8 = pnand %p567_p5, %p135_p7  ;;  %s826_s25 = smov [#allocation5]  }
   0xf   : > { %s147_s26 = sshll.u32 %s826_s25, 4  ;;  %s32_s28 = sadd.s32 1, %s820_s16  ;;  %s148_s26 = int_to_ptr.vmem [resolvable:$true] %s147_s26 }
  0x10   : > { %p610_p9 = pneg %p914_p8  ;;  %s697_s29 = scalar_lea.vmem %s148_s26, 512 }
  0x11   : > { %p698_p13 = scmp.ne.s32.totalorder %s148_s26, %s697_s29  ;;  %p705_p5 = scmp.lt.s32.totalorder %s148_s26, %s148_s26 }
  0x12   : > { %p923_p11 = pnand %p610_p9, %p894_p1  ;;  %p706_p7 = scmp.lt.s32.totalorder %s697_s29, %s697_s29 }
  0x14   : > { %p688_p12 = pneg %p923_p11  ;;  %p707_p6 = por %p706_p7, %p705_p5 }
  0x16   : > { %p700_p0 = pnand %p698_p13, %p688_p12 }
  0x18   : > { %p701_p3 = pneg %p700_p0 }
  0x1a   : > { %p708_p4 = pnand %p707_p6, %p701_p3 }
  0x1c   : > { %711 = shalt.err (!%p708_p4)
}
  0x1d   : > { %s827_s30 = smov 128   ;;  %s828_s4 = smov 8  }
  0x1e   : > { %613 = dma.hbm_to_vmem [thread:$0]  (!%p923_p11), %s1046_s1, 512, %s148_s26, [#allocation6], %s827_s30, %s827_s30, %s828_s4  }
  0x1f   : > { %p34_p6 = scmp.ge.s32.totalorder %s32_s28, 2  ;;  %s41_s7 = sadd.s32 1, %s812_s14 }
  0x20   : > { %p48_p4 = scmp.ne.s32.totalorder %s812_s14, %s808_s13  ;;  %p49_p9 = scmp.eq.s32.totalorder %s824_s17, 0 }
  0x21   : > { %s1068_s28 = smov (%p34_p6, %s32_s28), 0  ;;  %p623_p0 = scmp.lt.s32.totalorder %s824_s17, 2 }
  0x22   : > { %p941_p12 = por %p49_p9, %p48_p4  ;;  %p947_p13 = por %p898_p2, %p48_p4 }
  0x23   : > { %s36_s10 = ssub.s32 %s820_s16, %s1068_s28  ;;  %s164_s11 = sand.u32 1, %s812_s14  }
  0x24   : > { %p39_p11 = scmp.eq.s32.totalorder %s36_s10, 0  ;;  %s570_s18 = sshll.u32 %s164_s11, 3 }
  0x25   : > { %s571_s25 = sshll.u32 %s820_s16, 7  ;;  %s168_s30 = scalar_lea.vmem [#allocation2], %s570_s18 }
  0x26   : > { %s956_s19 = scalar_select %p39_p11, %s812_s14, %s41_s7  }
  0x27   : > { %s174_s29 = scalar_lea.hbm %s1045_s0, %s571_s25  ;;  %s176_s4 = sshll.u32 %s168_s30, 4  ;;  %s177_s4 = int_to_ptr.vmem [resolvable:$true] %s176_s4 }
  0x28   : > { %p964_p2 = pnand %p623_p0, %p941_p12  ;;  %s165_s5 = scalar_lea.sflag [#allocation3], %s164_s11 }
  0x29   : > { %s725_s6 = scalar_lea.vmem %s177_s4, 128  ;;  %s829_s7 = smov [#allocation2]  }
  0x2a   : > { %p714_p3 = pneg %p964_p2  ;;  %p726_p5 = scmp.ne.s32.totalorder %s177_s4, %s725_s6 }
  0x2b   : > { %s730_s10 = sshll.u32 %s829_s7, 4  ;;  %s731_s10 = int_to_ptr.vmem [resolvable:$false] %s730_s10 }
  0x2c   : > { %p728_p7 = pnand %p726_p5, %p714_p3  ;;  %s732_s25 = scalar_lea.vmem %s731_s10, 256 }
  0x2d   : > { %p733_p4 = scmp.lt.s32.totalorder %s177_s4, %s731_s10  ;;  %p734_p9 = scmp.lt.s32.totalorder %s732_s25, %s725_s6 }
  0x2e   : > { %p729_p6 = pneg %p728_p7 }
  0x2f   : > { %p735_p11 = por %p734_p9, %p733_p4 }
  0x31   : > { %p736_p10 = pnand %p735_p11, %p729_p6 }
  0x33   : > { %739 = shalt.err (!%p736_p10)
}
  0x34   : > { %617 = dma.hbm_to_vmem [thread:$0]  (!%p964_p2), %s174_s29, 128, %s177_s4, %s165_s5  }
  0x35   : > { %185 = sbr.rel (%p914_p8) target bundleno = 419 (0x1a3), region = 32  ;;  %s975_s8 = sand.u32 (!%p914_p8), 1, %s808_s13  }
  0x36   : > { %s573_s11 = sshll.u32 (!%p914_p8), %s975_s8, 3  ;;  %s188_s18 = scalar_lea.sflag (!%p914_p8), [#allocation3], %s975_s8 }
  0x37   : > { %s191_s26 = scalar_lea.vmem (!%p914_p8), [#allocation2], %s573_s11  ;;  %p1059_p12 = scmp.ne.s32.totalorder (!%p914_p8), %s1052_s22, 0 }
  0x3a   : > { %791 = dma.done.wait (%p1059_p12), %s188_s18, 128  }
  0x3b   : > { %793 = vsyncadd (%p1059_p12), %s188_s18, 4294967168 }
  0x3c   : > { %795 = dma.done.wait (%p894_p1), [#allocation6], 512  }
  0x3d   : > { %797 = vsyncadd (%p894_p1), [#allocation6], 4294966784  ;;  %v830_v0 = vmov 0.0   ;;  %vm831_vm0 = vmmov 0   ;;  %v222_v1 = vld [vmem:[#allocation5 + $0x18] sm:$0xff]  ;;  %v221_v2 = vld [vmem:[#allocation5 + $0x10] sm:$0xff]  ;;  %v320_v13 = vlaneseq }
  0x3e   : > { %591 = vmatprep.subr.mxu0 %v830_v0  ;;  %599 = vmatprep.mubr.msk.f32.mxu0 %vm831_vm0, %v830_v0  ;;  %v220_v3 = vld [vmem:[#allocation5 + $0x8] sm:$0xff]  ;;  %v219_v4 = vld [vmem:[#allocation5] sm:$0xff]  ;;  %v218_v5 = vld [vmem:[%s191_s26] sm:$0xff]  ;;  %vm230_vm1 = vcmask 261120   ;;  %s832_s24 = smov 104   ;;  %s833_s27 = smov 120  }
  0x3f   : > { %592 = vmatpush3.msra.mxu0 %v222_v1  ;;  %v576_v6 = vld [vmem:[%s1047_s2] ss:$0 sm:$0xff]  ;;  %s834_s29 = smov 112   ;;  %v835_v11 = vmov 1983009808   ;;  %v321_v17 = vshrl.u32 %v320_v13, 7 }
  0x40   : > { %593 = vmatprep.subr.mxu0 %v830_v0  ;;  %v318_v12 = vunpack.c.l.s4 %v835_v11  ;;  %v836_v14 = vmov 1934713408   ;;  %s575_s30 = sshll.u32 %s975_s8, 5  ;;  %s585_s4 = sshll.u32 %s816_s15, 9  ;;  %vm451_vm2 = vcmask 64512  }
  0x41   : > { %594 = vmatpush3.msra.mxu0 %v221_v2  ;;  %v350_v15 = vunpack.c.l.s4 %v836_v14  ;;  %s217_s21 = scalar_lea.vmem [#allocation7], %s575_s30  ;;  %s995_s10 = scalar_lea.hbm %s1048_s3, %s585_s4 }
  0x42   : > { %595 = vmatprep.subr.mxu0 %v830_v0  ;;  %v319_v16 = vunpack.c.0.s8 %v318_v12  ;;  %s471_s5 = sshll.u32 %s217_s21, 4  ;;  %s457_s15 = scalar_lea.sflag [#allocation4], %s975_s8  ;;  %s997_s5 = int_to_ptr.vmem [resolvable:$true] %s471_s5 }
  0x43   : > { %596 = vmatpush3.msra.mxu0 %v220_v3  ;;  %v351_v20 = vunpack.c.0.s8 %v350_v15  ;;  %s740_s25 = scalar_lea.vmem %s997_s5, 512  ;;  %s837_s11 = smov [#allocation7]  }
  0x44   : > { %597 = vmatprep.subr.mxu0 %v830_v0  ;;  %v322_v21 = vsub.s32 %v319_v16, %v321_v17  ;;  %p741_p1 = scmp.ne.s32.totalorder %s997_s5, %s740_s25  ;;  %s744_s18 = sshll.u32 %s837_s11, 4  ;;  %s745_s18 = int_to_ptr.vmem [resolvable:$false] %s744_s18 }
  0x45   : > { %598 = vmatpush3.msra.mxu0 %v219_v4  ;;  %v354_v27 = vsub.s32 %v351_v20, %v321_v17  ;;  %s746_s26 = scalar_lea.vmem %s745_s18, 1024  ;;  %p747_p0 = scmp.lt.s32.totalorder %s997_s5, %s745_s18 }
  0x46   : > { %600 = vmatmul.mubr.msk.f32.vlgmr.msra.gmra.mxu0 %vm230_vm1, %v218_v5  ;;  %p742_p8 = pnand %p741_p1, %p947_p13  ;;  %p748_p2 = scmp.lt.s32.totalorder %s746_s26, %s740_s25 }
  0x48   : > { %p743_p10 = pneg %p742_p8  ;;  %p749_p3 = por %p748_p2, %p747_p0 }
  0x4a   : > { %p750_p5 = pnand %p749_p3, %p743_p10 }
 0x106   : > { %v300_v7 = vpop.f32.mrf.mxu0 }
 0x107   : > { %v301_v8 = vadd.f32 %v576_v6, %v300_v7 }
 0x108   : > { %v601_v9 = vpop.f32.mrf.mxu0 }
 0x109   : > { %v304_v10 = vmul.f32 0.35355338, %v301_v8 }
 0x10b   : > { %312 = vrot.lane.b32.xlu1 %v304_v10, %s832_s24  ;;  %306 = vrot.lane.b32.xlu0 %v304_v10, %s833_s27 }
 0x10f   : > { %309 = vrot.lane.b32.xlu0 %v304_v10, %s834_s29 }
 0x17d   : > { %v313_v18 = vpop.permute.xlu1 %312  ;;  %v307_v19 = vpop.permute.xlu0 %306 }
 0x17e   : > { %v331_v22 = vcombine.low %v307_v19, %v313_v18  ;;  %v332_v23 = vcombine.high %v307_v19, %v313_v18 }
 0x180   : > { %v339_v28 = vrot.slane %v331_v22, %v322_v21  ;;  %v346_v29 = vrot.slane %v332_v23, %v322_v21 }
 0x181   : > { %v310_v24 = vpop.permute.xlu0 %309 }
 0x182   : > { %v315_v25 = vcombine.low %v304_v10, %v310_v24  ;;  %v316_v26 = vcombine.high %v304_v10, %v310_v24 }
 0x184   : > { %v323_v30 = vrot.slane %v315_v25, %v322_v21  ;;  %v330_v31 = vrot.slane %v316_v26, %v322_v21 }
 0x186   : > { %v347_v32 = vcombine.low %v323_v30, %v339_v28  ;;  %v348_v33 = vcombine.high %v323_v30, %v339_v28  ;;  %v363_v34 = vcombine.low %v330_v31, %v346_v29  ;;  %v364_v35 = vcombine.high %v330_v31, %v346_v29 }
 0x188   : > { %v355_v36 = vrot.slane %v347_v32, %v354_v27  ;;  %v362_v37 = vrot.slane %v348_v33, %v354_v27  ;;  %v371_v38 = vrot.slane %v363_v34, %v354_v27  ;;  %v378_v39 = vrot.slane %v364_v35, %v354_v27 }
 0x18a   : > { %v383_v40 = vcombine.low %v355_v36, %v362_v37  ;;  %v578_v41 = vcombine.high %v355_v36, %v362_v37  ;;  %v399_v42 = vcombine.low %v371_v38, %v378_v39  ;;  %v579_v43 = vcombine.high %v371_v38, %v378_v39 }
 0x18c   : > { %v390_v44 = vrot.slane %v383_v40, %v322_v21  ;;  %v398_v45 = vrot.slane %v578_v41, %v322_v21  ;;  %v406_v46 = vrot.slane %v399_v42, %v322_v21  ;;  %v414_v47 = vrot.slane %v579_v43, %v322_v21 }
 0x18e   : > { %v415_v48 = vcombine.low %v390_v44, %v398_v45  ;;  %v416_v49 = vcombine.high %v390_v44, %v398_v45  ;;  %v431_v50 = vcombine.low %v406_v46, %v414_v47  ;;  %v432_v51 = vcombine.high %v406_v46, %v414_v47 }
 0x190   : > { %v423_v52 = vrot.slane %v415_v48, %v354_v27  ;;  %v430_v53 = vrot.slane %v416_v49, %v354_v27  ;;  %v439_v54 = vrot.slane %v431_v50, %v354_v27  ;;  %v446_v55 = vrot.slane %v432_v51, %v354_v27 }
 0x192   : > { %v447_v56 = vcombine.low %v423_v52, %v439_v54  ;;  %v448_v57 = vcombine.high %v423_v52, %v439_v54  ;;  %v449_v58 = vcombine.low %v430_v53, %v446_v55  ;;  %v450_v59 = vcombine.high %v430_v53, %v446_v55 }
 0x194   : > { %452 = vst.msk [vmem:[%s217_s21] sm:$0xff] %vm451_vm2, %v447_v56  ;;  %453 = vst.msk [vmem:[%s217_s21 + $0x8] sm:$0xff] %vm451_vm2, %v448_v57 }
 0x195   : > { %454 = vst.msk [vmem:[%s217_s21 + $0x10] sm:$0xff] %vm451_vm2, %v449_v58  ;;  %455 = vst.msk [vmem:[%s217_s21 + $0x18] sm:$0xff] %vm451_vm2, %v450_v59 }
 0x196   : > { %753 = shalt.err (!%p750_p5)
}
 0x197   : > { %s754_s20 = scalar_lea.hbm %s995_s10, 512  ;;  %s758_s27 = scalar_lea.hbm %s1048_s3, 1024 }
 0x198   : > { %p755_p7 = scmp.ne.s32.totalorder %s995_s10, %s754_s20  ;;  %p759_p9 = scmp.lt.s32.totalorder %s995_s10, %s1048_s3 }
 0x199   : > { %p760_p11 = scmp.lt.s32.totalorder %s758_s27, %s754_s20 }
 0x19a   : > { %p756_p6 = pnand %p755_p7, %p947_p13 }
 0x19b   : > { %p761_p12 = por %p760_p11, %p759_p9 }
 0x19c   : > { %p757_p4 = pneg %p756_p6 }
 0x19e   : > { %p762_p1 = pnand %p761_p12, %p757_p4 }
 0x1a0   : > { %765 = shalt.err (!%p762_p1)
}
 0x1a1   : > { %s838_s4 = smov 128   ;;  %s839_s21 = smov 8  }
 0x1a2   : > { %608 = dma.vmem_to_hbm [thread:$0]  (%p947_p13), %s997_s5, 512, %s995_s10, %s457_s15, %s838_s4, %s838_s4, %s839_s21  }
 0x1a3 PF: > { %s486_s6 = sand.u32 1, %s804_s12   ;;  %p1060_p8 = scmp.ne.s32.totalorder %s1053_s23, 0 }
 0x1a4   : > { %p1061_p10 = scmp.ge.s32.totalorder %s824_s17, 2  ;;  %s487_s7 = scalar_lea.sflag [#allocation4], %s486_s6 }
 0x1a6   : > { %p619_p0 = pnand %p1061_p10, %p1060_p8 }
 0x1a8   : > { %p620_p2 = pneg %p619_p0 }
 0x1aa   : > { %799 = dma.done.wait (%p620_p2), %s487_s7, 512  }
 0x1ab   : > { %801 = vsyncadd (%p620_p2), %s487_s7, 4294966784  ;;  %s20_s17 = sadd.s32 1, %s824_s17   ;;  %s1062_s12 = smov %s808_s13 }
 0x1ac   : > { %p17_p3 = scmp.ge.s32.totalorder %s20_s17, 4   ;;  %s1063_s13 = smov %s812_s14 }
 0x1ad   : > { %s1064_s14 = smov %s956_s19  ;;  %s1065_s15 = smov %s820_s16 }
 0x1ae   : > { %s1066_s16 = smov %s1068_s28  ;;  %19 = sbr.rel (!%p17_p3) target bundleno = 7 (0x7), region = 81 }
 0x1b3   :  { %492 = vsyncpa [#allocation3], 1 }
 0x1b4   :  { %494 = vsyncpa [#allocation3 + $0x1], 1 }
 0x1b5   :  { %495 = vsyncpa [#allocation6], 1 }
 0x1b6   :  { %496 = vsyncpa [#allocation4], 1 }
 0x1b7   :  { %498 = vsyncpa [#allocation4 + $0x1], 1 }

</bundles_post_ra>
